<compile_context>
chip_gen: v5e
topology: v5e:2x2
jax: 0.10.0
libtpu: 0.0.40
codegen_flags: <defaults>
</compile_context>

<pallas_src>
import functools

import jax
import jax.numpy as jnp
from jax.experimental import pallas as pl
from jax.experimental.pallas import tpu as pltpu


_LANES = 128
_SMALL_N_FASTPATH = 1024     # below ~one (8,128) tile, plain XLA max is strictly faster


def _tpu_layout_info():
    """Chip-aware (tensorcores_per_device, target_block_bytes, vmem_limit_bytes)."""
    try:
        kind = jax.devices()[0].device_kind.lower()
    except Exception:
        kind = ""
    if "v7" in kind or "7x" in kind:
        # 2 TensorCores/device, 64 MiB VMEM per TC, ~3.2 TB/s HBM per TC:
        # ~8 MiB blocks (16 MiB double-buffered) keep per-step overhead <5%.
        return 2, 8 * 1024 * 1024, 48 * 1024 * 1024
    # v5e / v6e: single TensorCore, 128 MiB physical VMEM, 0.8-1.4 TB/s HBM:
    # ~4 MiB blocks are already <10% step overhead; bigger buys nothing.
    return 1, 4 * 1024 * 1024, 64 * 1024 * 1024


# ----------------------------- Pallas kernel ------------------------------ #

def _max_reduce_kernel(x_ref, o_ref, *, rows, block_rows, tiles_per_core, fold):
    """Streaming global max over a (rows, 128) slab.

    Grid = (ncores, tiles_per_core):
      axis 0 ("parallel")  -> sharded across TensorCores on 2-TC chips (v7x)
      axis 1 ("arbitrary") -> reduction axis; output block stays resident in VMEM
    The f32 accumulator block is (fold, 128): one vreg-row per native sublane set
    of the streamed dtype, so the per-tile update is a single elementwise vmax.
    """
    c = pl.program_id(0)
    i = pl.program_id(1)

    @pl.when(i == 0)
    def _():
        o_ref[...] = jnp.full(o_ref.shape, -jnp.inf, dtype=o_ref.dtype)

    tile = c * tiles_per_core + i                 # global (unclamped) tile index
    is_full = (tile + 1) * block_rows <= rows     # interior tile (no invalid rows)

    @pl.when(is_full)
    def _():
        # Fast path (all tiles but at most one per core): one vmax per vreg.
        xv = x_ref[...].reshape(-1, fold, _LANES)
        part = jnp.max(xv, axis=0).astype(jnp.float32)
        o_ref[...] = jnp.maximum(o_ref[...], part)

    @pl.when(jnp.logical_not(is_full))
    def _():
        # Tail tile (and clamped OOB tiles): mask invalid rows before reducing.
        # valid_rows <= 0 for fully-OOB tiles -> whole tile masked to the fill
        # value, so re-reading the clamped block stays correct.
        valid_rows = rows - tile * block_rows
        xv = x_ref[...]
        if jnp.issubdtype(xv.dtype, jnp.integer):
            fill = jnp.array(jnp.iinfo(xv.dtype).min, dtype=xv.dtype)
        else:
            fill = jnp.array(-jnp.inf, dtype=xv.dtype)
        row_ids = jax.lax.broadcasted_iota(jnp.int32, (block_rows, 1), 0)
        xv = jnp.where(row_ids < valid_rows, xv, fill)
        part = jnp.max(xv.reshape(-1, fold, _LANES), axis=0).astype(jnp.float32)
        o_ref[...] = jnp.maximum(o_ref[...], part)


def pallas_global_max(x: jax.Array, *, block_bytes=None, ncores=None) -> jax.Array:
    """Max over all elements of x as a tiled Pallas reduction. Returns an f32 scalar."""
    dt = x.dtype
    if not (jnp.issubdtype(dt, jnp.floating) or jnp.issubdtype(dt, jnp.integer)):
        x = x.astype(jnp.float32)        # bool / exotic dtypes only; rare path
        dt = x.dtype

    n = x.size
    if n < _SMALL_N_FASTPATH:
        # Tiny inputs: pallas_call launch overhead dominates; plain XLA is faster.
        return jnp.max(x).astype(jnp.float32)

    chip_ncores, chip_block_bytes, vmem_limit = _tpu_layout_info()
    ncores = chip_ncores if ncores is None else ncores
    block_bytes = chip_block_bytes if block_bytes is None else block_bytes

    itemsize = jnp.dtype(dt).itemsize
    fold = 8 * max(1, 4 // max(1, itemsize))       # rows/vreg: 8 f32, 16 bf16, 32 int8
    blk_max = max(fold, (block_bytes // (_LANES * itemsize)) // fold * fold)

    xf = x.reshape(-1)                   # free reshape (row-major contiguous)
    n_main = (n // _LANES) * _LANES
    rows = n_main // _LANES
    x2d = xf[:n_main].reshape(rows, _LANES)        # no-op when n % 128 == 0

    blk = min(blk_max, pl.cdiv(rows, fold) * fold)
    n_tiles = pl.cdiv(rows, blk)
    if n_tiles < 2:
        ncores = 1
    if ncores == 2 and n_tiles % 2:
        # Nudge the block size so the tile count is even and neither core runs a
        # redundant clamped OOB block DMA. If rounding keeps it odd, the masked
        # OOB path below still guarantees correctness.
        blk_alt = pl.cdiv(pl.cdiv(rows, n_tiles + 1), fold) * fold
        if pl.cdiv(rows, blk_alt) % 2 == 0:
            blk = blk_alt
            n_tiles = pl.cdiv(rows, blk)
    tiles_per_core = pl.cdiv(n_tiles, ncores)
    max_blk_idx = n_tiles - 1            # clamp so OOB tiles re-read a valid block
                                         # (their contribution is masked to -inf)

    kernel = functools.partial(
        _max_reduce_kernel, rows=rows, block_rows=blk,
        tiles_per_core=tiles_per_core, fold=fold)

    # Leading axis shards across TensorCores on 2-TC chips; reduction axis last.
    # TODO(synk): on v7x, pltpu.CORE_PARALLEL / pl.core_map gives a stronger
    # guarantee that the leading axis is really core-sharded; "parallel" kept
    # here as the proven-clean option.
    out = pl.pallas_call(
        kernel,
        out_shape=jax.ShapeDtypeStruct((ncores * fold, _LANES), jnp.float32),
        grid_spec=pltpu.PrefetchScalarGridSpec(
            num_scalar_prefetch=0,
            grid=(ncores, tiles_per_core),
            in_specs=[pl.BlockSpec(
                (blk, _LANES),
                lambda c, i: (jnp.minimum(c * tiles_per_core + i, max_blk_idx), 0))],
            out_specs=pl.BlockSpec((fold, _LANES), lambda c, i: (c, 0)),
        ),
        compiler_params=pltpu.CompilerParams(
            dimension_semantics=("parallel", "arbitrary"),
            vmem_limit_bytes=vmem_limit,
        ),
    )(x2d)

    s = jnp.max(out)                     # one small cross-lane/sublane reduce in XLA
    if n_main < n:
        # <128 leftover elements that don't fill a lane row: reduce in plain JAX.
        s = jnp.maximum(s, jnp.max(xf[n_main:]).astype(jnp.float32))
    return s


# ----------------------------- Module wrapper ------------------------------ #

@functools.partial(jax.jit, static_argnames=("momentum", "mode"))
def voltage_hook_forward(x, scale, num_batches_tracked, *, momentum=0.1, mode="MaxNorm"):
    """Functional VoltageHook.forward.

    Returns (y, new_scale, new_num_batches_tracked); y is x unchanged.
    scale is carried in float32 (matches the PyTorch buffer after the first
    assignment from a float tensor).
    """
    if mode == "MaxNorm":
        s_t = pallas_global_max(x)
    else:
        # The provided module uses np.percentile(x, 99); some spikingjelly versions
        # use 99.9 -- this follows the provided spec (99.0).
        # TODO(synk): global quantile needs a sort/selection; a streaming per-tile
        # histogram on the same Pallas pipeline would avoid the O(n log n) sort,
        # but the exact-percentile fallback stays in plain JAX here.
        s_t = jnp.percentile(x.astype(jnp.float32), 99.0)

    scale = scale.astype(jnp.float32)
    new_scale = jnp.where(
        num_batches_tracked == 0,
        s_t,
        (1.0 - momentum) * scale + momentum * s_t,
    )
    new_nbt = num_batches_tracked + x.shape[0]
    return x, new_scale, new_nbt


# ---------------------------------- Main ----------------------------------- #

if __name__ == "__main__":
    key = jax.random.PRNGKey(0)
    # NCHW, small shapes: batch=2, channels=4, spatial=16x16
    x = jax.random.normal(key, (2, 4, 16, 16), dtype=jnp.float32)

    # Deterministic initial buffer state, matching VoltageHook.__init__(scale=1.0)
    scale = jnp.asarray(1.0, dtype=jnp.float32)
    num_batches_tracked = jnp.asarray(0, dtype=jnp.int32)
    momentum = 0.1

    # First call: num_batches_tracked == 0  ->  scale = max(x)
    y, scale, num_batches_tracked = voltage_hook_forward(
        x, scale, num_batches_tracked, momentum=momentum, mode="MaxNorm"
    )
    jax.block_until_ready((y, scale, num_batches_tracked))
    assert jnp.array_equal(y, x), "forward must return x unchanged"
    assert jnp.allclose(scale, jnp.max(x)), "first-batch scale must equal max(x)"
    assert int(num_batches_tracked) == 2

    # Second call: momentum update path
    x2 = jax.random.normal(jax.random.PRNGKey(1), (2, 4, 16, 16), dtype=jnp.float32)
    prev_scale = scale
    y2, scale, num_batches_tracked = voltage_hook_forward(
        x2, scale, num_batches_tracked, momentum=momentum, mode="MaxNorm"
    )
    jax.block_until_ready((y2, scale, num_batches_tracked))
    ref_scale = (1.0 - momentum) * prev_scale + momentum * jnp.max(x2)
    assert jnp.allclose(scale, ref_scale, rtol=1e-6, atol=1e-6)
    assert int(num_batches_tracked) == 4

    # Extra coverage of the Pallas reduction paths:
    # multi-tile reduction with a masked tail tile + sub-lane remainder (~10 MiB)
    xl = jax.random.normal(jax.random.PRNGKey(2), (2_560_037,), dtype=jnp.float32)
    assert jnp.allclose(pallas_global_max(xl), jnp.max(xl))
    # ragged small input (size not a multiple of 128 -> masked rows + tail combine)
    xr = jax.random.normal(jax.random.PRNGKey(3), (2, 3, 15, 15), dtype=jnp.float32)
    assert jnp.allclose(pallas_global_max(xr), jnp.max(xr))
    # native bf16 streaming (half HBM bytes; partial upcast in-kernel)
    xb = jax.random.normal(jax.random.PRNGKey(4), (4, 8, 32, 32),
                           dtype=jnp.float32).astype(jnp.bfloat16)
    assert jnp.allclose(pallas_global_max(xb), jnp.max(xb).astype(jnp.float32))
    # native int32 streaming (f32 cast folded into the in-kernel per-tile partial)
    xi = jax.random.randint(jax.random.PRNGKey(5), (3, 5, 17, 19), -1000, 1000,
                            dtype=jnp.int32)
    assert jnp.allclose(pallas_global_max(xi), jnp.max(xi).astype(jnp.float32))

    print("KERNEL_OK")
</pallas_src>

<mosaic_0001>
module attributes {stable_mosaic.version = 11 : i64} {
  func.func @_max_reduce_kernel(%arg0: i32, %arg1: i32, %arg2: memref<16x128xf32, #tpu.memory_space<vmem>>, %arg3: memref<8x128xf32, #tpu.memory_space<vmem>>) attributes {dimension_semantics = [#tpu.dimension_semantics<parallel>, #tpu.dimension_semantics<arbitrary>], iteration_bounds = array<i64: 1, 1>, scalar_prefetch = 0 : i64, scratch_operands = 0 : i64, tpu.core_type = #tpu.core_type<tc>, window_params = [{transform_indices = @transform_0, window_bounds = array<i64: 16, 128>}, {transform_indices = @transform_1, window_bounds = array<i64: 8, 128>}]} {
    %c0_i32 = arith.constant 0 : i32
    %0 = arith.cmpi eq, %arg1, %c0_i32 : i32
    %1 = arith.extui %0 : i1 to i32
    %c0_i32_0 = arith.constant 0 : i32
    %2 = arith.cmpi ne, %1, %c0_i32_0 : i32
    scf.if %2 {
      %cst = arith.constant 0xFF800000 : f32
      %13 = vector.broadcast %cst : f32 to vector<8x128xf32>
      %c0 = arith.constant 0 : index
      %c0_5 = arith.constant 0 : index
      %14 = vector.load %arg3[%c0, %c0_5] : memref<8x128xf32, #tpu.memory_space<vmem>>, vector<8x128xf32>
      tpu.vector_store %arg3[%c0, %c0_5], %13 {strides = array<i32>} : memref<8x128xf32, #tpu.memory_space<vmem>>, vector<8x128xf32>,
    } else {
    }
    %c1_i32 = arith.constant 1 : i32
    %3 = arith.muli %arg0, %c1_i32 : i32
    %4 = arith.addi %3, %arg1 : i32
    %c1_i32_1 = arith.constant 1 : i32
    %5 = arith.addi %4, %c1_i32_1 : i32
    %c16_i32 = arith.constant 16 : i32
    %6 = arith.muli %5, %c16_i32 : i32
    %c16_i32_2 = arith.constant 16 : i32
    %7 = arith.cmpi sle, %6, %c16_i32_2 : i32
    %8 = arith.extui %7 : i1 to i32
    %c0_i32_3 = arith.constant 0 : i32
    %9 = arith.cmpi ne, %8, %c0_i32_3 : i32
    scf.if %9 {
      %c0 = arith.constant 0 : index
      %c0_5 = arith.constant 0 : index
      %13 = vector.load %arg2[%c0, %c0_5] : memref<16x128xf32, #tpu.memory_space<vmem>>, vector<16x128xf32>
      %14 = vector.shape_cast %13 : vector<16x128xf32> to vector<2x8x128xf32>
      %cst = arith.constant dense<0xFF800000> : vector<8x128xf32>
      %15 = vector.multi_reduction <maximumf>, %14, %cst [0] : vector<2x8x128xf32> to vector<8x128xf32>
      %c0_6 = arith.constant 0 : index
      %c0_7 = arith.constant 0 : index
      %16 = vector.load %arg3[%c0_6, %c0_7] : memref<8x128xf32, #tpu.memory_space<vmem>>, vector<8x128xf32>
      %17 = arith.maximumf %16, %15 : vector<8x128xf32>
      %c0_8 = arith.constant 0 : index
      %c0_9 = arith.constant 0 : index
      %18 = vector.load %arg3[%c0_8, %c0_9] : memref<8x128xf32, #tpu.memory_space<vmem>>, vector<8x128xf32>
      tpu.vector_store %arg3[%c0_8, %c0_9], %17 {strides = array<i32>} : memref<8x128xf32, #tpu.memory_space<vmem>>, vector<8x128xf32>,
    } else {
    }
    %true = arith.constant true
    %10 = arith.xori %7, %true : i1
    %11 = arith.extui %10 : i1 to i32
    %c0_i32_4 = arith.constant 0 : i32
    %12 = arith.cmpi ne, %11, %c0_i32_4 : i32
    scf.if %12 {
      %c16_i32_5 = arith.constant 16 : i32
      %13 = arith.muli %4, %c16_i32_5 : i32
      %c16_i32_6 = arith.constant 16 : i32
      %14 = arith.subi %c16_i32_6, %13 : i32
      %c0 = arith.constant 0 : index
      %c0_7 = arith.constant 0 : index
      %15 = vector.load %arg2[%c0, %c0_7] : memref<16x128xf32, #tpu.memory_space<vmem>>, vector<16x128xf32>
      %16 = tpu.iota {dimensions = array<i32: 0>} : vector<16x1xi32>
      %17 = vector.broadcast %14 : i32 to vector<16x1xi32>
      %18 = arith.cmpi slt, %16, %17 : vector<16x1xi32>
      %cst = arith.constant 0xFF800000 : f32
      %19 = vector.shape_cast %18 : vector<16x1xi1> to vector<16x1xi1>
      %20 = vector.broadcast %19 : vector<16x1xi1> to vector<16x128xi1>
      %21 = vector.broadcast %cst : f32 to vector<16x128xf32>
      %22 = arith.select %20, %15, %21 : vector<16x128xi1>, vector<16x128xf32>
      %23 = vector.shape_cast %22 : vector<16x128xf32> to vector<2x8x128xf32>
      %cst_8 = arith.constant dense<0xFF800000> : vector<8x128xf32>
      %24 = vector.multi_reduction <maximumf>, %23, %cst_8 [0] : vector<2x8x128xf32> to vector<8x128xf32>
      %c0_9 = arith.constant 0 : index
      %c0_10 = arith.constant 0 : index
      %25 = vector.load %arg3[%c0_9, %c0_10] : memref<8x128xf32, #tpu.memory_space<vmem>>, vector<8x128xf32>
      %26 = arith.maximumf %25, %24 : vector<8x128xf32>
      %c0_11 = arith.constant 0 : index
      %c0_12 = arith.constant 0 : index
      %27 = vector.load %arg3[%c0_11, %c0_12] : memref<8x128xf32, #tpu.memory_space<vmem>>, vector<8x128xf32>
      tpu.vector_store %arg3[%c0_11, %c0_12], %26 {strides = array<i32>} : memref<8x128xf32, #tpu.memory_space<vmem>>, vector<8x128xf32>,
    } else {
    }
    return
  }
  func.func @transform_0(%arg0: i32, %arg1: i32) -> (i32, i32) {
    %c1_i32 = arith.constant 1 : i32
    %0 = arith.muli %arg0, %c1_i32 : i32
    %1 = arith.addi %0, %arg1 : i32
    %c0_i32 = arith.constant 0 : i32
    %2 = arith.minsi %1, %c0_i32 : i32
    %c0_i32_0 = arith.constant 0 : i32
    %c0_i32_1 = arith.constant 0 : i32
    return %2, %c0_i32_0 : i32, i32
  }
  func.func @transform_1(%arg0: i32, %arg1: i32) -> (i32, i32) {
    %c0_i32 = arith.constant 0 : i32
    %c0_i32_0 = arith.constant 0 : i32
    return %arg0, %c0_i32 : i32, i32
  }
}

</mosaic_0001>

<bundles_post_ra>
// kernel: voltage_hook_forward.1
= control target key start
LH: loop header
LB: loop body
LE: loop exit
PB: predicated region body
PF: predicated region fallthrough
CT: control target
= control target key end

     0   :  { %s112_s0 = inlined_call_operand.vmem [shape: f32[16,128], index: 0, kind: input, shape index: {}]   ;;  %s113_s1 = inlined_call_operand.vmem [shape: f32[8,128], index: 1, kind: output, shape index: {}]  }
   0x1   :  { %v52_v0 = vld [vmem:[%s112_s0] sm:$0xff]  ;;  %v53_v1 = vld [vmem:[%s112_s0 + $0x8] sm:$0xff] }
   0x2   :  { %v54_v2 = vmax.f32 %v52_v0, %v53_v1 }
   0x4   :  { %57 = vst [vmem:[%s113_s1] sm:$0xff] %v54_v2 }

</bundles_post_ra>
